<compile_context>
chip_gen: v6e
topology: v6e:2x2x1
jax: 0.10.0
libtpu: 0.0.40
codegen_flags: <defaults>
</compile_context>

<pallas_src>
import functools
import math

import jax
import jax.numpy as jnp
from jax.experimental import pallas as pl
from jax.experimental.pallas import tpu as pltpu


def _round_up(x, m):
    return ((x + m - 1) // m) * m


def _timestep_embedder_kernel(t_ref, freqs_ref, w_ref, b_ref, o_ref, emb_ref,
                              *, half, cache_emb):
    # t_ref:     (tm, 1)    f32   timesteps for this batch tile
    # freqs_ref: (1, half)  f32   exp(-log(max_period) * k / half)
    # w_ref:     (F, tn)    weight tile, pre-transposed vs torch Linear -> (in, out)
    # b_ref:     (1, tn)    bias tile (lane-padded)
    # o_ref:     (tm, tn)   output tile (weight dtype)
    # emb_ref:   (tm, F)    VMEM scratch holding [cos | sin] in the weight dtype

    def _compute_embedding():
        args = t_ref[...] * freqs_ref[...]                    # (tm, half) f32, VPU bcast
        # half % 128 == 0, so both writes are contiguous lane-aligned vreg placement,
        # not an XLU relayout.  Casting to the weight dtype keeps bf16 weights bf16
        # end-to-end (the MXU accumulation below stays f32); for bf16 weights this
        # costs ~3 decimal digits vs an f32 reference, matching bf16 Linear semantics.
        emb_ref[:, :half] = jnp.cos(args).astype(emb_ref.dtype)
        emb_ref[:, half:] = jnp.sin(args).astype(emb_ref.dtype)

    if cache_emb:
        # H axis (grid axis 1, innermost, "arbitrary") revisits the same batch tile:
        # compute sin/cos once per batch tile and reuse across all H tiles.
        @pl.when(pl.program_id(1) == 0)
        def _():
            _compute_embedding()
    else:
        _compute_embedding()

    # Single fused K=F contraction (fills the 256-deep MXU on v6e/v7x).
    acc = jnp.dot(emb_ref[...], w_ref[...], preferred_element_type=jnp.float32)
    o_ref[...] = (acc + b_ref[...].astype(jnp.float32)).astype(o_ref.dtype)


def prepare_timestep_embedder_params(w, b, frequency_embedding_size=256,
                                     max_period=10000):
    """One-time (init-time) parameter prep: lane-pad W/b, build freqs table.

    w: (F, H) Linear weight, already transposed to (in, out) vs torch's (out, in)
    b: (H,)   Linear bias
    Returns (w_padded (F, Hp), b_padded (1, Hp), freqs (1, half), hidden_size H).
    """
    F, H = w.shape
    assert F == frequency_embedding_size
    assert frequency_embedding_size % 2 == 0
    half = F // 2
    # TODO(synk): general half (not a multiple of 128) and the odd-dim zero-pad branch
    # of the torch reference (dim % 2 == 1) are not implemented.
    assert half % 128 == 0, "frequency_embedding_size must be a multiple of 256"

    Hp = max(128, _round_up(H, 128))
    if Hp != H:
        w = jnp.pad(w, ((0, 0), (0, Hp - H)))
        b = jnp.pad(b, ((0, Hp - H),))
    b2d = b.reshape(1, Hp)

    freqs = jnp.exp(
        -math.log(max_period) * jnp.arange(half, dtype=jnp.float32) / half
    ).reshape(1, half)
    return w, b2d, freqs, H


def _select_tiles(N, Hp):
    if N <= 128:
        tm = max(8, _round_up(N, 8))           # single batch tile, sublane aligned
    else:
        # Up to 512-row tiles; choose the candidate that minimizes padded rows,
        # preferring larger tiles on ties (amortizes ~0.35us/step grid overhead).
        tm, best_pad = None, None
        for cand in (512, 256, 128):
            pad = _round_up(N, cand) - N
            if best_pad is None or pad < best_pad:
                tm, best_pad = cand, pad
    # H tile: largest of {512, 256, 128} dividing Hp (Hp is a multiple of 128).
    # This bounds the per-step weight block at F*tn regardless of hidden size, so
    # the VMEM footprint never approaches even v7x's smaller scoped limit.
    tn = 512 if Hp % 512 == 0 else (256 if Hp % 256 == 0 else 128)
    return tm, tn


def timestep_embedder_forward(t, w_p, b_p, freqs, hidden_size):
    """Forward with pre-prepared (padded) params. Returns (N, hidden_size)."""
    F, Hp = w_p.shape
    half = F // 2
    N = t.shape[0]

    tm, tn = _select_tiles(N, Hp)
    Np = _round_up(N, tm)

    t2d = jnp.asarray(t, dtype=jnp.float32).reshape(N, 1)
    if Np != N:
        t2d = jnp.pad(t2d, ((0, Np - N), (0, 0)))

    n_m, n_n = Np // tm, Hp // tn
    # Cache sin/cos across H tiles only when there are multiple batch tiles (large-N
    # path, EUP-bound): requires the H axis to be "arbitrary" (sequential per core).
    # For the single-batch-tile latency path keep both axes "parallel" so the H tiles
    # can be sharded across v7x's two TensorCores.
    cache_emb = n_m > 1

    kernel = functools.partial(_timestep_embedder_kernel, half=half,
                               cache_emb=cache_emb)
    out = pl.pallas_call(
        kernel,
        out_shape=jax.ShapeDtypeStruct((Np, Hp), w_p.dtype),
        grid_spec=pltpu.PrefetchScalarGridSpec(
            num_scalar_prefetch=0,
            grid=(n_m, n_n),
            in_specs=[
                pl.BlockSpec((tm, 1), lambda i, j: (i, 0)),
                pl.BlockSpec((1, half), lambda i, j: (0, 0)),
                pl.BlockSpec((F, tn), lambda i, j: (0, j)),
                pl.BlockSpec((1, tn), lambda i, j: (0, j)),
            ],
            out_specs=pl.BlockSpec((tm, tn), lambda i, j: (i, j)),
            scratch_shapes=[pltpu.VMEM((tm, F), w_p.dtype)],
        ),
        compiler_params=pltpu.CompilerParams(
            dimension_semantics=(("parallel", "arbitrary") if cache_emb
                                 else ("parallel", "parallel"))),
    )(t2d, freqs, w_p, b_p)

    # Only pay the extra HBM round trip when padding actually occurred.
    if Np != N or Hp != hidden_size:
        out = out[:N, :hidden_size]
    return out


def timestep_embedder(t, w, b, frequency_embedding_size=256, max_period=10000):
    """Convenience one-shot wrapper (prefer preparing params once at model init)."""
    w_p, b_p, freqs, H = prepare_timestep_embedder_params(
        w, b, frequency_embedding_size, max_period)
    return timestep_embedder_forward(t, w_p, b_p, freqs, H)


def _reference(t, w, b, F, max_period=10000):
    half = F // 2
    freqs = jnp.exp(-math.log(max_period) * jnp.arange(half, dtype=jnp.float32) / half)
    args = t.astype(jnp.float32)[:, None] * freqs[None, :]
    emb = jnp.concatenate([jnp.cos(args), jnp.sin(args)], axis=-1)
    return emb @ w + b


if __name__ == "__main__":
    frequency_embedding_size = 256
    key = jax.random.PRNGKey(0)
    k_t1, k_t2, k_t3, k_w, k_b, k_w2, k_b2 = jax.random.split(key, 7)

    bound = 1.0 / math.sqrt(frequency_embedding_size)

    # --- case A: hidden_size=32 (lane-padded output), prepared once at "init" ---
    hidden_size = 32
    w = jax.random.uniform(k_w, (frequency_embedding_size, hidden_size),
                           dtype=jnp.float32, minval=-bound, maxval=bound)
    b = jax.random.uniform(k_b, (hidden_size,), dtype=jnp.float32,
                           minval=-bound, maxval=bound)
    w_p, b_p, freqs, H = prepare_timestep_embedder_params(w, b, frequency_embedding_size)

    # small-N latency path (single batch tile, single H tile)
    N1 = 8
    t1 = jax.random.uniform(k_t1, (N1,), dtype=jnp.float32, minval=0.0, maxval=1000.0)
    out1 = jax.block_until_ready(timestep_embedder_forward(t1, w_p, b_p, freqs, H))
    ref1 = _reference(t1, w, b, frequency_embedding_size)
    assert out1.shape == (N1, hidden_size)
    assert out1.dtype == w.dtype
    assert jnp.allclose(out1, ref1, atol=1e-4, rtol=1e-4)

    # large-N path (multiple batch tiles -> cached sin/cos, padded rows)
    N2 = 300
    t2 = jax.random.uniform(k_t2, (N2,), dtype=jnp.float32, minval=0.0, maxval=1000.0)
    out2 = jax.block_until_ready(timestep_embedder_forward(t2, w_p, b_p, freqs, H))
    ref2 = _reference(t2, w, b, frequency_embedding_size)
    assert out2.shape == (N2, hidden_size)
    assert jnp.allclose(out2, ref2, atol=1e-4, rtol=1e-4)

    # --- case B: hidden_size=300 (multiple H tiles, padded lanes), one-shot wrapper ---
    hidden_size_b = 300
    w2 = jax.random.uniform(k_w2, (frequency_embedding_size, hidden_size_b),
                            dtype=jnp.float32, minval=-bound, maxval=bound)
    b2 = jax.random.uniform(k_b2, (hidden_size_b,), dtype=jnp.float32,
                            minval=-bound, maxval=bound)
    N3 = 16
    t3 = jax.random.uniform(k_t3, (N3,), dtype=jnp.float32, minval=0.0, maxval=1000.0)
    out3 = jax.block_until_ready(timestep_embedder(t3, w2, b2, frequency_embedding_size))
    ref3 = _reference(t3, w2, b2, frequency_embedding_size)
    assert out3.shape == (N3, hidden_size_b)
    assert jnp.allclose(out3, ref3, atol=1e-4, rtol=1e-4)

    print("KERNEL_OK")
</pallas_src>

<mosaic_0001>
module attributes {stable_mosaic.version = 11 : i64} {
  func.func @_timestep_embedder_kernel(%arg0: i32, %arg1: i32, %arg2: memref<8x1xf32, #tpu.memory_space<vmem>>, %arg3: memref<1x128xf32, #tpu.memory_space<vmem>>, %arg4: memref<256x128xf32, #tpu.memory_space<vmem>>, %arg5: memref<1x128xf32, #tpu.memory_space<vmem>>, %arg6: memref<8x128xf32, #tpu.memory_space<vmem>>, %arg7: memref<8x256xf32, #tpu.memory_space<vmem>>) attributes {dimension_semantics = [#tpu.dimension_semantics<parallel>, #tpu.dimension_semantics<parallel>], iteration_bounds = array<i64: 1, 1>, scalar_prefetch = 0 : i64, scratch_operands = 1 : i64, tpu.core_type = #tpu.core_type<tc>, window_params = [{transform_indices = @transform_0, window_bounds = array<i64: 8, 1>}, {pipeline_mode = #tpu.pipeline_mode<synchronous>, transform_indices = @transform_1, window_bounds = array<i64: 1, 128>}, {transform_indices = @transform_2, window_bounds = array<i64: 256, 128>}, {transform_indices = @transform_3, window_bounds = array<i64: 1, 128>}, {transform_indices = @transform_4, window_bounds = array<i64: 8, 128>}]} {
    %c0 = arith.constant 0 : index
    %c0_0 = arith.constant 0 : index
    %0 = vector.load %arg2[%c0, %c0_0] : memref<8x1xf32, #tpu.memory_space<vmem>>, vector<8x1xf32>
    %c0_1 = arith.constant 0 : index
    %c0_2 = arith.constant 0 : index
    %1 = vector.load %arg3[%c0_1, %c0_2] : memref<1x128xf32, #tpu.memory_space<vmem>>, vector<1x128xf32>
    %2 = vector.broadcast %0 : vector<8x1xf32> to vector<8x128xf32>
    %3 = vector.broadcast %1 : vector<1x128xf32> to vector<8x128xf32>
    %4 = arith.mulf %2, %3 : vector<8x128xf32>
    %5 = math.cos %4 : vector<8x128xf32>
    %c0_3 = arith.constant 0 : index
    %c0_4 = arith.constant 0 : index
    %6 = vector.load %arg7[%c0_3, %c0_4] : memref<8x256xf32, #tpu.memory_space<vmem>>, vector<8x128xf32>
    tpu.vector_store %arg7[%c0_3, %c0_4], %5 {strides = array<i32>} : memref<8x256xf32, #tpu.memory_space<vmem>>, vector<8x128xf32>,
    %7 = math.sin %4 : vector<8x128xf32>
    %c0_5 = arith.constant 0 : index
    %c128 = arith.constant 128 : index
    %8 = vector.load %arg7[%c0_5, %c128] : memref<8x256xf32, #tpu.memory_space<vmem>>, vector<8x128xf32>
    tpu.vector_store %arg7[%c0_5, %c128], %7 {strides = array<i32>} : memref<8x256xf32, #tpu.memory_space<vmem>>, vector<8x128xf32>,
    %c0_6 = arith.constant 0 : index
    %c0_7 = arith.constant 0 : index
    %9 = vector.load %arg7[%c0_6, %c0_7] : memref<8x256xf32, #tpu.memory_space<vmem>>, vector<8x256xf32>
    %c0_8 = arith.constant 0 : index
    %c0_9 = arith.constant 0 : index
    %10 = vector.load %arg4[%c0_8, %c0_9] : memref<256x128xf32, #tpu.memory_space<vmem>>, vector<256x128xf32>
    %cst = arith.constant dense<0.000000e+00> : vector<8x128xf32>
    %11 = tpu.matmul %9, %10, %cst {dimension_numbers = #tpu.dot_dimension_numbers<[1], [0], [0], [1], [0, 0, 1, 1], [], []>} : vector<8x256xf32>, vector<256x128xf32>, vector<8x128xf32> -> vector<8x128xf32>
    %c0_10 = arith.constant 0 : index
    %c0_11 = arith.constant 0 : index
    %12 = vector.load %arg5[%c0_10, %c0_11] : memref<1x128xf32, #tpu.memory_space<vmem>>, vector<1x128xf32>
    %13 = vector.broadcast %12 : vector<1x128xf32> to vector<8x128xf32>
    %14 = arith.addf %11, %13 : vector<8x128xf32>
    %c0_12 = arith.constant 0 : index
    %c0_13 = arith.constant 0 : index
    %15 = vector.load %arg6[%c0_12, %c0_13] : memref<8x128xf32, #tpu.memory_space<vmem>>, vector<8x128xf32>
    tpu.vector_store %arg6[%c0_12, %c0_13], %14 {strides = array<i32>} : memref<8x128xf32, #tpu.memory_space<vmem>>, vector<8x128xf32>,
    return
  }
  func.func @transform_0(%arg0: i32, %arg1: i32) -> (i32, i32) {
    %c0_i32 = arith.constant 0 : i32
    %c0_i32_0 = arith.constant 0 : i32
    return %arg0, %c0_i32 : i32, i32
  }
  func.func @transform_1(%arg0: i32, %arg1: i32) -> (i32, i32) {
    %c0_i32 = arith.constant 0 : i32
    %c0_i32_0 = arith.constant 0 : i32
    %c0_i32_1 = arith.constant 0 : i32
    return %c0_i32, %c0_i32_0 : i32, i32
  }
  func.func @transform_2(%arg0: i32, %arg1: i32) -> (i32, i32) {
    %c0_i32 = arith.constant 0 : i32
    %c0_i32_0 = arith.constant 0 : i32
    return %c0_i32, %arg1 : i32, i32
  }
  func.func @transform_3(%arg0: i32, %arg1: i32) -> (i32, i32) {
    %c0_i32 = arith.constant 0 : i32
    %c0_i32_0 = arith.constant 0 : i32
    return %c0_i32, %arg1 : i32, i32
  }
  func.func @transform_4(%arg0: i32, %arg1: i32) -> (i32, i32) {
    %c0_i32 = arith.constant 0 : i32
    return %arg0, %arg1 : i32, i32
  }
}

</mosaic_0001>

<bundles_post_ra>
// kernel: tpu_custom_call.1
= control target key start
LH: loop header
LB: loop body
LE: loop exit
PB: predicated region body
PF: predicated region fallthrough
CT: control target
= control target key end

     0   :  { %9 = vsyncpa [#allocation4], 0  ;;  %s563_s0 = inlined_call_operand.vmem [shape: f32[8,1], index: 0, kind: input, shape index: {}]   ;;  %s564_s1 = inlined_call_operand.vmem [shape: f32[1,128], index: 1, kind: input, shape index: {}]   ;;  %s565_s2 = inlined_call_operand.hbm [shape: f32[256,128], index: 2, kind: input, shape index: {}]   ;;  %s566_s3 = inlined_call_operand.vmem [shape: f32[1,128], index: 3, kind: input, shape index: {}]   ;;  %s567_s4 = inlined_call_operand.hbm [shape: f32[8,128], index: 4, kind: output, shape index: {}]  }
   0x1   :  { %10 = vsyncpa [#allocation5], 0  ;;  %s491_s15 = smov [#allocation3]  }
   0x2   :  { %s20_s16 = sshll.u32 %s491_s15, 4  ;;  %s21_s16 = int_to_ptr.vmem [resolvable:$true] %s20_s16 }
   0x3   :  { %s455_s17 = scalar_lea.vmem %s21_s16, 4096  ;;  %p460_p1 = scmp.lt.s32.totalorder %s21_s16, %s21_s16 }
   0x4   :  { %p456_p0 = scmp.ne.s32.totalorder %s21_s16, %s455_s17  ;;  %p461_p2 = scmp.lt.s32.totalorder %s455_s17, %s455_s17 }
   0x6   :  { %p462_p3 = por %p461_p2, %p460_p1 }
   0x8   :  { %p463_p4 = pnand %p462_p3, %p456_p0 }
   0xa   :  { %466 = shalt.err (!%p463_p4)
}
   0xb   :  { %s492_s18 = smov 128   ;;  %s493_s19 = smov 8  }
   0xc   :  { %26 = dma.hbm_to_vmem [thread:$0]  %s565_s2, 4096, %s21_s16, [#allocation4], %s492_s18, %s492_s18, %s493_s19  }
   0xd   :  { %487 = dma.done.wait [#allocation4], 4096  }
   0xe   :  { %488 = vsyncadd [#allocation4], 4294963200  ;;  %v494_v0 = vmov 0   ;;  %v32_v1 = vld [vmem:[%s563_s0] sm:$0xff]  ;;  %v288_v2 = vld [vmem:[#allocation3 + $0xf8] sm:$0xff]  ;;  %s501_s25 = smov [#allocation6]  }
   0xf   :  { %442 = vset.pattern.permute.xlu0 %v494_v0  ;;  %v272_v3 = vld [vmem:[#allocation3 + $0x78] sm:$0xff]  ;;  %v287_v4 = vld [vmem:[#allocation3 + $0xf0] sm:$0xff]  ;;  %392 = vmatprep.subr.mxu0 %v288_v2  ;;  %v286_v6 = vld [vmem:[#allocation3 + $0xe8] sm:$0xff]  ;;  %v495_v48 = vmov 2102212464   ;;  %s373_s26 = sshll.u32 %s501_s25, 4  ;;  %s374_s26 = int_to_ptr.vmem [resolvable:$true] %s373_s26 }
  0x10   :  { %36 = vperm.xlu0 %442, %v32_v1   ;;  %v271_v5 = vld [vmem:[#allocation3 + $0x70] sm:$0xff]  ;;  %393 = vmatpush3.msra.mxu0 %v272_v3  ;;  %v270_v7 = vld [vmem:[#allocation3 + $0x68] sm:$0xff]  ;;  %v285_v8 = vld [vmem:[#allocation3 + $0xe0] sm:$0xff]  ;;  %v496_v50 = vmov 920167782   ;;  %s467_s27 = scalar_lea.vmem %s374_s26, 128  ;;  %p472_p6 = scmp.lt.s32.totalorder %s374_s26, %s374_s26 }
  0x11   :  { %394 = vmatprep.subr.mxu0 %v287_v4  ;;  %v269_v9 = vld [vmem:[#allocation3 + $0x60] sm:$0xff]  ;;  %v284_v10 = vld [vmem:[#allocation3 + $0xd8] sm:$0xff]  ;;  %v283_v12 = vld [vmem:[#allocation3 + $0xd0] sm:$0xff]  ;;  %v497_v54 = vmov 1326507024   ;;  %p468_p5 = scmp.ne.s32.totalorder %s374_s26, %s467_s27  ;;  %p473_p7 = scmp.lt.s32.totalorder %s467_s27, %s467_s27 }
  0x12   :  { %395 = vmatpush3.msra.mxu0 %v271_v5  ;;  %v268_v11 = vld [vmem:[#allocation3 + $0x58] sm:$0xff]  ;;  %v267_v13 = vld [vmem:[#allocation3 + $0x50] sm:$0xff]  ;;  %v282_v14 = vld [vmem:[#allocation3 + $0xc8] sm:$0xff]  ;;  %v498_v56 = vmov 683565275  }
  0x13   :  { %396 = vmatprep.subr.mxu0 %v286_v6  ;;  %v266_v15 = vld [vmem:[#allocation3 + $0x48] sm:$0xff]  ;;  %v281_v16 = vld [vmem:[#allocation3 + $0xc0] sm:$0xff]  ;;  %v280_v18 = vld [vmem:[#allocation3 + $0xb8] sm:$0xff]  ;;  %v499_v58 = vmov 2475754826   ;;  %p474_p8 = por %p473_p7, %p472_p6 }
  0x14   :  { %397 = vmatpush3.msra.mxu0 %v270_v7  ;;  %v265_v17 = vld [vmem:[#allocation3 + $0x40] sm:$0xff]  ;;  %v264_v19 = vld [vmem:[#allocation3 + $0x38] sm:$0xff]  ;;  %v279_v20 = vld [vmem:[#allocation3 + $0xb0] sm:$0xff]  ;;  %v500_v61 = vmov 2131351028  }
  0x15   :  { %398 = vmatprep.subr.mxu0 %v285_v8  ;;  %v263_v21 = vld [vmem:[#allocation3 + $0x30] sm:$0xff]  ;;  %v278_v22 = vld [vmem:[#allocation3 + $0xa8] sm:$0xff]  ;;  %v277_v24 = vld [vmem:[#allocation3 + $0xa0] sm:$0xff]  ;;  %p475_p9 = pnand %p474_p8, %p468_p5 }
  0x16   :  { %399 = vmatpush3.msra.mxu0 %v269_v9  ;;  %v262_v23 = vld [vmem:[#allocation3 + $0x28] sm:$0xff]  ;;  %v261_v25 = vld [vmem:[#allocation3 + $0x20] sm:$0xff]  ;;  %v276_v26 = vld [vmem:[#allocation3 + $0x98] sm:$0xff] }
  0x17   :  { %400 = vmatprep.subr.mxu0 %v284_v10  ;;  %v260_v27 = vld [vmem:[#allocation3 + $0x18] sm:$0xff]  ;;  %v275_v28 = vld [vmem:[#allocation3 + $0x90] sm:$0xff]  ;;  %v274_v30 = vld [vmem:[#allocation3 + $0x88] sm:$0xff] }
  0x18   :  { %401 = vmatpush3.msra.mxu0 %v268_v11  ;;  %v259_v29 = vld [vmem:[#allocation3 + $0x10] sm:$0xff]  ;;  %v258_v31 = vld [vmem:[#allocation3 + $0x8] sm:$0xff]  ;;  %v273_v32 = vld [vmem:[#allocation3 + $0x80] sm:$0xff] }
  0x19   :  { %402 = vmatprep.subr.mxu0 %v283_v12  ;;  %v257_v33 = vld [vmem:[#allocation3] sm:$0xff] }
  0x1a   :  { %403 = vmatpush3.msra.mxu0 %v267_v13  ;;  %v382_v34 = vld [vmem:[%s564_s1] ss:$0 sm:$0xff] }
  0x1b   :  { %404 = vmatprep.subr.mxu0 %v282_v14 }
  0x1c   :  { %405 = vmatpush3.msra.mxu0 %v266_v15 }
  0x1d   :  { %406 = vmatprep.subr.mxu0 %v281_v16 }
  0x1e   :  { %407 = vmatpush3.msra.mxu0 %v265_v17 }
  0x1f   :  { %408 = vmatprep.subr.mxu0 %v280_v18 }
  0x20   :  { %409 = vmatpush3.msra.mxu0 %v264_v19 }
  0x21   :  { %410 = vmatprep.subr.mxu0 %v279_v20 }
  0x22   :  { %411 = vmatpush3.msra.mxu0 %v263_v21 }
  0x23   :  { %412 = vmatprep.subr.mxu0 %v278_v22 }
  0x24   :  { %413 = vmatpush3.msra.mxu0 %v262_v23 }
  0x25   :  { %414 = vmatprep.subr.mxu0 %v277_v24 }
  0x26   :  { %415 = vmatpush3.msra.mxu0 %v261_v25 }
  0x27   :  { %416 = vmatprep.subr.mxu0 %v276_v26 }
  0x28   :  { %417 = vmatpush3.msra.mxu0 %v260_v27 }
  0x29   :  { %418 = vmatprep.subr.mxu0 %v275_v28 }
  0x2a   :  { %419 = vmatpush3.msra.mxu0 %v259_v29 }
  0x2b   :  { %420 = vmatprep.subr.mxu0 %v274_v30 }
  0x2c   :  { %421 = vmatpush3.msra.mxu0 %v258_v31 }
  0x2d   :  { %422 = vmatprep.subr.mxu0 %v273_v32 }
  0x2e   :  { %423 = vmatpush3.msra.mxu0 %v257_v33 }
  0x8b   :  { %v37_v35 = vpop.permute.xlu0 %36 }
  0x8c   :  { %v536_v36 = vmul.f32 %v382_v34, %v37_v35 }
  0x8e   :  { %v49_v37 = vand.u32 2139095040, %v536_v36  ;;  %v46_v38 = vand.u32 2147483647, %v536_v36  ;;  %vm48_vm7 = vcmp.lt.s32.totalorder %v536_v36, 0  ;;  %vm138_vm15 = vweird.f32 %v536_v36 }
  0x90   :  { %v50_v39 = vshrl.u32 %v49_v37, 23  ;;  %v53_v41 = vand.u32 8388607, %v46_v38  ;;  %vm47_vm8 = vcmp.le.f32.partialorder %v46_v38, 0.7853982 }
  0x92   :  { %v383_v40 = vadd.s32 4294967169, %v50_v39  ;;  %v54_v44 = vor.u32 8388608, %v53_v41 }
  0x94   :  { %v56_v42 = vadd.s32 1, %v383_v40  ;;  %v94_v52 = vshll.u32 %v54_v44, 8 }
  0x96   :  { %vm57_vm0 = vcmp.gt.s32.totalorder %v56_v42, 0 }
  0x97   :  { %v58_v43 = vsel %vm57_vm0, %v56_v42, 0 }
  0x98   :  { %v60_v45 = vand.u32 31, %v58_v43  ;;  %v59_v46 = vshrl.u32 %v58_v43, 5 }
  0x9a   :  { %v61_v47 = vsub.s32 32, %v60_v45  ;;  %v72_v49 = vshll.u32 %v495_v48, %v60_v45  ;;  %v75_v51 = vshll.u32 %v496_v50, %v60_v45  ;;  %v63_v57 = vshll.u32 %v498_v56, %v60_v45 }
  0x9b   :  { %v66_v60 = vshll.u32 %v499_v58, %v60_v45  ;;  %v69_v63 = vshll.u32 %v500_v61, %v60_v45  ;;  %vm81_vm1 = vcmp.lt.s32.totalorder %v59_v46, 4  ;;  %vm78_vm2 = vcmp.lt.s32.totalorder %v59_v46, 1 }
  0x9c   :  { %v73_v53 = vshrl.u32 %v496_v50, %v61_v47  ;;  %v76_v55 = vshrl.u32 %v497_v54, %v61_v47  ;;  %v64_v59 = vshrl.u32 %v499_v58, %v61_v47  ;;  %v67_v62 = vshrl.u32 %v500_v61, %v61_v47 }
  0x9d   :  { %v70_v0 = vshrl.u32 %v495_v48, %v61_v47  ;;  %v62_v4 = vshrl.u32 %v498_v56, %v61_v47  ;;  %vm79_vm3 = vcmp.lt.s32.totalorder %v59_v46, 2  ;;  %vm80_vm4 = vcmp.lt.s32.totalorder %v59_v46, 3 }
  0x9e   :  { %v74_v1 = vor.u32 %v73_v53, %v72_v49  ;;  %v77_v2 = vor.u32 %v76_v55, %v75_v51  ;;  %v65_v3 = vor.u32 %v64_v59, %v63_v57  ;;  %v68_v5 = vor.u32 %v67_v62, %v66_v60 }
  0x9f   :  { %v71_v6 = vor.u32 %v70_v0, %v69_v63 }
  0xa0   :  { %v87_v7 = vsel %vm81_vm1, %v74_v1, 920167782  ;;  %v91_v8 = vsel %vm81_vm1, %v77_v2, 1326507024  ;;  %v86_v10 = vsel %vm78_vm2, %v65_v3, %v68_v5  ;;  %v82_v13 = vsel %vm78_vm2, %v62_v4, %v65_v3 }
  0xa1   :  { %v83_v9 = vsel %vm81_vm1, %v71_v6, 2102212464  ;;  %v88_v11 = vsel %vm80_vm4, %v71_v6, %v87_v7  ;;  %v90_v12 = vsel %vm78_vm2, %v68_v5, %v71_v6  ;;  %v92_v16 = vsel %vm80_vm4, %v74_v1, %v91_v8  ;;  %v391_v7 = vld [vmem:[%s566_s3] ss:$0 sm:$0xff] }
  0xa2   :  { %v84_v14 = vsel %vm80_vm4, %v68_v5, %v83_v9  ;;  %v89_v15 = vsel %vm79_vm3, %v86_v10, %v88_v11  ;;  %v93_v17 = vsel %vm79_vm3, %v90_v12, %v92_v16 }
  0xa3   :  { %v542_v18 = vmul.u32.u64.low %v94_v52, %v89_v15  ;;  %v543_v19 = vmul.u32.u64.high %v94_v52, %v89_v15, %v542_v18  ;;  %v545_v20 = vmul.u32.u64.low %v94_v52, %v93_v17  ;;  %v546_v21 = vmul.u32.u64.high %v94_v52, %v93_v17, %v545_v20 }
  0xa4   :  { %v85_v22 = vsel %vm79_vm3, %v82_v13, %v84_v14 }
  0xa5   :  { %v104_v23 = vadd.s32 1, %v543_v19  ;;  %v101_v24 = vmul.u32 %v94_v52, %v85_v22  ;;  %vm103_vm5 = vc.u32 %v546_v21, %v542_v18  ;;  %v102_v37 = vadd.s32 %v542_v18, %v546_v21 }
  0xa7   :  { %v105_v25 = vsel %vm103_vm5, %v104_v23, %v543_v19 }
  0xa8   :  { %v106_v26 = vadd.s32 %v105_v25, %v101_v24 }
  0xaa   :  { %v107_v27 = vadd.s32 536870912, %v106_v26 }
  0xac   :  { %v108_v28 = vshrl.u32 %v107_v27, 30 }
  0xae   :  { %v109_v29 = vshll.u32 %v108_v28, 30  ;;  %v132_v51 = vsub.s32 4, %v108_v28 }
  0xb0   :  { %v110_v30 = vsub.s32 %v106_v26, %v109_v29  ;;  %v133_v54 = vsel %vm48_vm7, %v132_v51, %v108_v28 }
  0xb1   :  { %v135_v55 = vsel %vm47_vm8, 0, %v133_v54 }
  0xb2   :  { %v112_v31 = vsub.s32 0, %v110_v30  ;;  %v243_v56 = vadd.s32 3, %v135_v55  ;;  %v139_v58 = vand.u32 3, %v135_v55 }
  0xb4   :  { %v384_v32 = vmin.u32 %v112_v31, %v110_v30  ;;  %v244_v57 = vand.u32 3, %v243_v56  ;;  %vm144_vm10 = vcmp.eq.s32.totalorder %v139_v58, 2  ;;  %vm141_vm12 = vcmp.eq.s32.totalorder %v139_v58, 0 }
  0xb5   :  { %vm140_vm14 = vcmp.lt.s32.totalorder %v139_v58, 2 }
  0xb6   :  { %v114_v33 = vclz %v384_v32  ;;  %vm249_vm9 = vcmp.eq.s32.totalorder %v244_v57, 2  ;;  %vm246_vm11 = vcmp.eq.s32.totalorder %v244_v57, 0  ;;  %vm245_vm13 = vcmp.lt.s32.totalorder %v244_v57, 2 }
  0xb8   :  { %v385_v34 = vadd.s32 4294967294, %v114_v33 }
  0xba   :  { %vm386_vm6 = vcmp.lt.s32.totalorder %v385_v34, 0 }
  0xbb   :  { %v117_v35 = vsel %vm386_vm6, 0, %v385_v34 }
  0xbc   :  { %v118_v39 = vsub.s32 32, %v117_v35  ;;  %v122_v40 = vsub.s32 4294967266, %v117_v35  ;;  %v119_v41 = vshll.u32 %v110_v30, %v117_v35 }
  0xbe   :  { %v120_v42 = vshrl.u32 %v102_v37, %v118_v39  ;;  %v123_v43 = vadd.s32 127, %v122_v40 }
  0xc0   :  { %v121_v44 = vor.u32 %v120_v42, %v119_v41  ;;  %v124_v45 = vshll.u32 %v123_v43, 23 }
  0xc2   :  { %v125_v46 = vor.u32 4788187, %v124_v45  ;;  %v128_v48 = vcvt.s32.f32 %v121_v44 }
  0xc4   :  { %v126_v47 = vand.u32 2147483647, %v125_v46 }
  0xc6   :  { %v129_v49 = vmul.f32 %v128_v48, %v126_v47 }
  0xc8   :  { %v130_v50 = vxor.u32 2147483648, %v129_v49 }
  0xca   :  { %v131_v52 = vsel %vm48_vm7, %v130_v50, %v129_v49 }
  0xcb   :  { %v134_v53 = vsel %vm47_vm8, %v536_v36, %v131_v52 }
  0xcc   :  { %443 = vcosq.f32 %v134_v53 }
  0xcd   :  { %445 = vsinq.f32 %v134_v53 }
  0xd9   :  { %v444_v59 = vpop.eup %443 }
  0xda   :  { %v446_v60 = vpop.eup %445  ;;  %v145_v61 = vxor.u32 2147483648, %v444_v59 }
  0xdb   :  { %v142_v62 = vxor.u32 2147483648, %v446_v60 }
  0xdc   :  { %v251_v63 = vsel %vm249_vm9, %v145_v61, %v446_v60  ;;  %v146_v38 = vsel %vm144_vm10, %v145_v61, %v446_v60 }
  0xdd   :  { %v248_v0 = vsel %vm246_vm11, %v444_v59, %v142_v62  ;;  %v143_v1 = vsel %vm141_vm12, %v444_v59, %v142_v62 }
  0xde   :  { %v252_v2 = vsel %vm245_vm13, %v248_v0, %v251_v63  ;;  %v147_v3 = vsel %vm140_vm14, %v143_v1, %v146_v38 }
  0xdf   :  { %v253_v4 = vsel %vm138_vm15, nan, %v252_v2  ;;  %v148_v5 = vsel %vm138_vm15, nan, %v147_v3 }
  0xe0   :  { %360 = vmatprep.mubr.f32.mxu0 %v253_v4 }
  0xe1   :  { %361 = vmatmul.mubr.f32.vlgmr.msra.gmra.mxu0 %v148_v5 }
 0x1a1   :  { %v424_v6 = vpop.f32.mrf.mxu0 }
 0x1a3   :  { %v425_v8 = vpop.f32.mrf.mxu0 }
 0x1a4   :  { %v426_v9 = vadd.f32 %v425_v8, %v424_v6 }
 0x1a6   :  { %v363_v10 = vadd.f32 %v426_v9, %v391_v7 }
 0x1a8   :  { %366 = vst [vmem:[#allocation6] sm:$0xff] %v363_v10 }
 0x1a9   :  { %478 = shalt.err (!%p475_p9)
}
 0x1aa   :  { %376 = dma.vmem_to_hbm [thread:$0]  %s374_s26, 128, %s567_s4, [#allocation5]  }
 0x1ab   :  { %489 = dma.done.wait [#allocation5], 128  }
 0x1ac   :  { %490 = vsyncadd [#allocation5], 4294967168 }
 0x1ad   :  { %380 = vsyncpa [#allocation4], 1 }
 0x1ae   :  { %381 = vsyncpa [#allocation5], 1 }

</bundles_post_ra>
